<compile_context>
chip_gen: v6e
topology: v6e:2x2x1
jax: 0.10.0
libtpu: 0.0.40
codegen_flags: <defaults>
</compile_context>

<pallas_src>
import functools

import jax
import jax.numpy as jnp
from jax.experimental import pallas as pl
from jax.experimental.pallas import tpu as pltpu


def _round_up(x, m):
    return (x + m - 1) // m * m


def classifier_kernel(x_ref, w_ref, b_ref, out_ref):
    x = x_ref[...]
    if x.dtype != jnp.bfloat16:
        x = x.astype(jnp.bfloat16)          # VPU cast; keeps the MXU feed bf16-native

    # fc: (bn, in_dim) @ (in_dim, out_p) -> f32 accumulate; bias carries the -1e30
    # sentinel on pad lanes (columns >= out_dim), so no in-kernel masking is needed.
    y = jnp.dot(x, w_ref[...], preferred_element_type=jnp.float32) + b_ref[...]

    # log_softmax over dim=1 (features). exp(-1e30 - m) underflows to exactly 0,
    # so pad lanes contribute nothing to the row sum.
    m = jnp.max(y, axis=1, keepdims=True)
    e = jnp.exp(y - m)
    logz = jnp.log(jnp.sum(e, axis=1, keepdims=True))
    out_ref[...] = (y - m - logz).astype(out_ref.dtype)


def classifier(x, w_fc_t, b_fc, *, block_n=1024, out_dtype=jnp.float32):
    """x: (N, in_dim); w_fc_t: (in_dim, out_dim) (pre-transposed Linear weight);
    b_fc: (out_dim,).  Returns (N, out_dim) log-probabilities."""
    N, in_dim = x.shape
    out_dim = w_fc_t.shape[1]

    # Lane-dense output slab: pad out_dim up to a multiple of 128 lanes.
    out_p = _round_up(out_dim, 128)

    # Weight: zero-pad the extra lanes, cast once to bf16 (halves DMA + VMEM footprint).
    w_p = jnp.pad(w_fc_t, ((0, 0), (0, out_p - out_dim))).astype(jnp.bfloat16)
    # Bias: f32, pad lanes get -1e30 so padded logits are neutralized for free.
    b_p = jnp.pad(b_fc.astype(jnp.float32)[None, :],
                  ((0, 0), (0, out_p - out_dim)),
                  constant_values=-1e30)

    # Row tiling: >= 8 rows/tile, aim for ~8+ grid steps when N allows, cap at block_n.
    bn = max(8, min(block_n, _round_up(pl.cdiv(N, 8), 8)))
    bn = _round_up(bn, 8)
    grid = (pl.cdiv(N, bn),)

    x_bytes = jnp.dtype(x.dtype).itemsize
    out_bytes = jnp.dtype(out_dtype).itemsize

    # VMEM budget: 2x-buffered x/out tiles + single-buffered resident weight/bias
    # + f32 logits/exp temporaries.  Only override the scoped limit when the default
    # (16 MiB on v5e) could be exceeded; cap at 64 MiB (v7x physical per-TC VMEM).
    vmem_est = (2 * bn * in_dim * x_bytes
                + 2 * bn * out_p * out_bytes
                + in_dim * out_p * 2
                + out_p * 4
                + 3 * bn * out_p * 4)
    compiler_kwargs = dict(dimension_semantics=("parallel",))
    if 2 * vmem_est > (12 << 20):
        compiler_kwargs["vmem_limit_bytes"] = int(min(2 * vmem_est, 64 << 20))

    cost = pl.CostEstimate(
        flops=2 * N * in_dim * out_p,
        transcendentals=N * out_p + N,            # exp per logit + log per row
        bytes_accessed=(N * in_dim * x_bytes
                        + in_dim * out_p * 2
                        + out_p * 4
                        + N * out_p * out_bytes))

    out = pl.pallas_call(
        classifier_kernel,
        out_shape=jax.ShapeDtypeStruct((N, out_p), out_dtype),
        grid_spec=pltpu.PrefetchScalarGridSpec(
            num_scalar_prefetch=0,
            grid=grid,
            in_specs=[
                # x tile: pipelined (double-buffered) over the row grid.
                pl.BlockSpec((bn, in_dim), lambda i: (i, 0)),
                # Resident weight / bias: constant index_map -> single buffer.
                pl.BlockSpec((in_dim, out_p), lambda i: (0, 0),
                             pipeline_mode=pl.Buffered(1)),
                pl.BlockSpec((1, out_p), lambda i: (0, 0),
                             pipeline_mode=pl.Buffered(1)),
            ],
            out_specs=pl.BlockSpec((bn, out_p), lambda i: (i, 0)),
        ),
        compiler_params=pltpu.CompilerParams(**compiler_kwargs),
        cost_estimate=cost,
    )(x, w_p, b_p)

    # Exact nn.Module output shape; consumers that accept the padded slab can skip this.
    return out[:, :out_dim]


def reference_f32(x, w_fc_t, b_fc):
    return jax.nn.log_softmax(x @ w_fc_t + b_fc[None, :], axis=1)


def reference_bf16_operands(x, w_fc_t, b_fc):
    xb = x.astype(jnp.bfloat16).astype(jnp.float32)
    wb = w_fc_t.astype(jnp.bfloat16).astype(jnp.float32)
    return jax.nn.log_softmax(xb @ wb + b_fc[None, :].astype(jnp.float32), axis=1)


if __name__ == "__main__":
    N, in_dim, out_dim = 8, 32, 10
    key = jax.random.PRNGKey(0)
    kx, kw, kb = jax.random.split(key, 3)

    x = jax.random.normal(kx, (N, in_dim), dtype=jnp.float32)

    # Deterministic nn.Linear-style uniform init.
    bound = 1.0 / jnp.sqrt(in_dim)
    w_fc_t = jax.random.uniform(kw, (in_dim, out_dim), jnp.float32, -bound, bound)
    b_fc = jax.random.uniform(kb, (out_dim,), jnp.float32, -bound, bound)

    out = classifier(x, w_fc_t, b_fc)
    out = jax.block_until_ready(out)

    assert out.shape == (N, out_dim)
    # Tight check vs. a reference that uses the same bf16 operands (f32 accumulation).
    ref_bf16 = reference_bf16_operands(x, w_fc_t, b_fc)
    assert jnp.allclose(out, ref_bf16, atol=2e-3, rtol=2e-3), "mismatch vs bf16-operand reference"
    # Loose check vs. the exact f32 reference (bf16 input rounding ~1e-2-level).
    ref_f32 = reference_f32(x, w_fc_t, b_fc)
    assert jnp.allclose(out, ref_f32, atol=5e-2, rtol=5e-2), "mismatch vs f32 reference"

    print("KERNEL_OK")
</pallas_src>

<mosaic_0001>
module attributes {stable_mosaic.version = 11 : i64} {
  func.func @classifier_kernel(%arg0: i32, %arg1: memref<8x32xf32, #tpu.memory_space<vmem>>, %arg2: memref<32x128xbf16, #tpu.memory_space<vmem>>, %arg3: memref<1x128xf32, #tpu.memory_space<vmem>>, %arg4: memref<8x128xf32, #tpu.memory_space<vmem>>) attributes {dimension_semantics = [#tpu.dimension_semantics<parallel>], iteration_bounds = array<i64: 1>, scalar_prefetch = 0 : i64, scratch_operands = 0 : i64, tpu.core_type = #tpu.core_type<tc>, window_params = [{transform_indices = @transform_0, window_bounds = array<i64: 8, 32>}, {pipeline_mode = #tpu.pipeline_mode<synchronous>, transform_indices = @transform_1, window_bounds = array<i64: 32, 128>}, {pipeline_mode = #tpu.pipeline_mode<synchronous>, transform_indices = @transform_2, window_bounds = array<i64: 1, 128>}, {transform_indices = @transform_3, window_bounds = array<i64: 8, 128>}]} {
    %c0 = arith.constant 0 : index
    %c0_0 = arith.constant 0 : index
    %0 = vector.load %arg1[%c0, %c0_0] : memref<8x32xf32, #tpu.memory_space<vmem>>, vector<8x32xf32>
    %1 = arith.truncf %0 : vector<8x32xf32> to vector<8x32xbf16>
    %c0_1 = arith.constant 0 : index
    %c0_2 = arith.constant 0 : index
    %2 = vector.load %arg2[%c0_1, %c0_2] : memref<32x128xbf16, #tpu.memory_space<vmem>>, vector<32x128xbf16>
    %cst = arith.constant dense<0.000000e+00> : vector<8x128xf32>
    %3 = tpu.matmul %1, %2, %cst {dimension_numbers = #tpu.dot_dimension_numbers<[1], [0], [0], [1], [0, 0, 1, 1], [], []>} : vector<8x32xbf16>, vector<32x128xbf16>, vector<8x128xf32> -> vector<8x128xf32>
    %c0_3 = arith.constant 0 : index
    %c0_4 = arith.constant 0 : index
    %4 = vector.load %arg3[%c0_3, %c0_4] : memref<1x128xf32, #tpu.memory_space<vmem>>, vector<1x128xf32>
    %5 = vector.broadcast %4 : vector<1x128xf32> to vector<8x128xf32>
    %6 = arith.addf %3, %5 : vector<8x128xf32>
    %cst_5 = arith.constant dense<0xFF800000> : vector<8xf32>
    %7 = vector.multi_reduction <maximumf>, %6, %cst_5 [1] : vector<8x128xf32> to vector<8xf32>
    %8 = vector.shape_cast %7 : vector<8xf32> to vector<8x1xf32>
    %9 = vector.broadcast %8 : vector<8x1xf32> to vector<8x128xf32>
    %10 = arith.subf %6, %9 : vector<8x128xf32>
    %11 = math.exp %10 : vector<8x128xf32>
    %cst_6 = arith.constant dense<0.000000e+00> : vector<8xf32>
    %12 = vector.multi_reduction <add>, %11, %cst_6 [1] : vector<8x128xf32> to vector<8xf32>
    %13 = vector.shape_cast %12 : vector<8xf32> to vector<8x1xf32>
    %14 = math.log %13 : vector<8x1xf32>
    %15 = vector.broadcast %8 : vector<8x1xf32> to vector<8x128xf32>
    %16 = arith.subf %6, %15 : vector<8x128xf32>
    %17 = vector.broadcast %14 : vector<8x1xf32> to vector<8x128xf32>
    %18 = arith.subf %16, %17 : vector<8x128xf32>
    %c0_7 = arith.constant 0 : index
    %c0_8 = arith.constant 0 : index
    %19 = vector.load %arg4[%c0_7, %c0_8] : memref<8x128xf32, #tpu.memory_space<vmem>>, vector<8x128xf32>
    tpu.vector_store %arg4[%c0_7, %c0_8], %18 {strides = array<i32>} : memref<8x128xf32, #tpu.memory_space<vmem>>, vector<8x128xf32>,
    return
  }
  func.func @transform_0(%arg0: i32) -> (i32, i32) {
    %c0_i32 = arith.constant 0 : i32
    %c0_i32_0 = arith.constant 0 : i32
    return %arg0, %c0_i32 : i32, i32
  }
  func.func @transform_1(%arg0: i32) -> (i32, i32) {
    %c0_i32 = arith.constant 0 : i32
    %c0_i32_0 = arith.constant 0 : i32
    %c0_i32_1 = arith.constant 0 : i32
    return %c0_i32, %c0_i32_0 : i32, i32
  }
  func.func @transform_2(%arg0: i32) -> (i32, i32) {
    %c0_i32 = arith.constant 0 : i32
    %c0_i32_0 = arith.constant 0 : i32
    %c0_i32_1 = arith.constant 0 : i32
    return %c0_i32, %c0_i32_0 : i32, i32
  }
  func.func @transform_3(%arg0: i32) -> (i32, i32) {
    %c0_i32 = arith.constant 0 : i32
    %c0_i32_0 = arith.constant 0 : i32
    return %arg0, %c0_i32 : i32, i32
  }
}

</mosaic_0001>

<bundles_post_ra>
// kernel: tpu_custom_call.1
= control target key start
LH: loop header
LB: loop body
LE: loop exit
PB: predicated region body
PF: predicated region fallthrough
CT: control target
= control target key end

     0   :  { %8 = vsyncpa [#allocation3], 0  ;;  %s271_s0 = inlined_call_operand.hbm [shape: f32[8,32], index: 0, kind: input, shape index: {}]   ;;  %s272_s1 = inlined_call_operand.hbm [shape: bf16[32,128], index: 1, kind: input, shape index: {}]   ;;  %s273_s2 = inlined_call_operand.vmem [shape: f32[1,128], index: 2, kind: input, shape index: {}]   ;;  %s274_s3 = inlined_call_operand.hbm [shape: f32[8,128], index: 3, kind: output, shape index: {}]  }
   0x1   :  { %9 = vsyncpa [#allocation6], 0 }
   0x2   :  { %10 = vsyncpa [#allocation4], 0  ;;  %s232_s12 = smov [#allocation2]   ;;  %s233_s14 = smov [#allocation5]  }
   0x3   :  { %s17_s13 = sshll.u32 %s232_s12, 4  ;;  %s26_s15 = sshll.u32 %s233_s14, 4  ;;  %s18_s13 = int_to_ptr.vmem [resolvable:$true] %s17_s13  ;;  %s27_s15 = int_to_ptr.vmem [resolvable:$true] %s26_s15 }
   0x4   :  { %s174_s16 = scalar_lea.vmem %s18_s13, 128  ;;  %p179_p1 = scmp.lt.s32.totalorder %s18_s13, %s18_s13 }
   0x5   :  { %p175_p0 = scmp.ne.s32.totalorder %s18_s13, %s174_s16  ;;  %p180_p2 = scmp.lt.s32.totalorder %s174_s16, %s174_s16 }
   0x7   :  { %p181_p3 = por %p180_p2, %p179_p1 }
   0x9   :  { %p182_p4 = pnand %p181_p3, %p175_p0 }
   0xb   :  { %185 = shalt.err (!%p182_p4)
}
   0xc   :  { %20 = dma.hbm_to_vmem [thread:$0]  %s271_s0, 128, %s18_s13, [#allocation3]  }
   0xd   :  { %s194_s19 = scalar_lea.vmem %s27_s15, 256  ;;  %p199_p6 = scmp.lt.s32.totalorder %s27_s15, %s27_s15 }
   0xe   :  { %p195_p5 = scmp.ne.s32.totalorder %s27_s15, %s194_s19  ;;  %p200_p7 = scmp.lt.s32.totalorder %s194_s19, %s194_s19 }
  0x10   :  { %p201_p8 = por %p200_p7, %p199_p6 }
  0x12   :  { %p202_p9 = pnand %p201_p8, %p195_p5 }
  0x14   :  { %205 = shalt.err (!%p202_p9)
}
  0x15   :  { %s234_s20 = smov 64   ;;  %s235_s21 = smov 4  }
  0x16   :  { %32 = dma.hbm_to_vmem [thread:$0]  %s272_s1, 256, %s27_s15, [#allocation6], %s234_s20, %s234_s20, %s235_s21  }
  0x17   :  { %226 = dma.done.wait [#allocation3], 128  }
  0x18   :  { %227 = vsyncadd [#allocation3], 4294967168 }
  0x19   :  { %228 = dma.done.wait [#allocation6], 256  }
  0x1a   :  { %229 = vsyncadd [#allocation6], 4294967040  ;;  %v236_v0 = vmov 0.0   ;;  %vm237_vm0 = vmmov 0   ;;  %v160_v1 = vld [vmem:[#allocation5 + $0x8] sm:$0xff]   ;;  %v161_v2 = vld [vmem:[#allocation5] sm:$0xff]  }
  0x1b   :  { %145 = vmatprep.subr.bf16.mxu0 %v236_v0  ;;  %149 = vmatprep.mubr.msk.bf16.mxu0 %vm237_vm0, %v236_v0  ;;  %v42_v3 = vld [vmem:[#allocation2] sm:$0xff]  ;;  %vm67_vm1 = vcmask 261120   ;;  %s238_s1 = smov [#allocation7]  }
  0x1c   :  { %146 = vmatpush3.bf16.msra.mxu0 %v160_v1  ;;  %v43_v4 = vpack.c.bf16 %v42_v3, %v42_v3  ;;  %v138_v5 = vld [vmem:[%s273_s2] ss:$0 sm:$0xff]  ;;  %s128_s25 = sshll.u32 %s238_s1, 4  ;;  %s129_s25 = int_to_ptr.vmem [resolvable:$true] %s128_s25 }
  0x1d   :  { %147 = vmatprep.subr.bf16.mxu0 %v236_v0  ;;  %s206_s2 = scalar_lea.vmem %s129_s25, 128  ;;  %p211_p11 = scmp.lt.s32.totalorder %s129_s25, %s129_s25 }
  0x1e   :  { %p207_p10 = scmp.ne.s32.totalorder %s129_s25, %s206_s2  ;;  %p212_p12 = scmp.lt.s32.totalorder %s206_s2, %s206_s2 }
  0x20   :  { %148 = vmatpush3.bf16.msra.mxu0 %v161_v2  ;;  %p213_p13 = por %p212_p12, %p211_p11 }
  0x22   :  { %p214_p0 = pnand %p213_p13, %p207_p10 }
  0x23   :  { %150 = vmatmul.mubr.msk.bf16.vlgmr.msra.gmra.mxu0 %vm67_vm1, %v43_v4 }
  0xe3   :  { %v105_v6 = vpop.f32.mrf.mxu0 }
  0xe4   :  { %v106_v7 = vadd.f32 %v138_v5, %v105_v6 }
  0xe5   :  { %v151_v8 = vpop.f32.mrf.mxu0 }
  0xe6   :  { %111 = vmax.xlane.f32.xlu0 %v106_v7 }
  0xe7   :  { %v108_v9 = vpop.f32.mrf.mxu0 }
  0xe9   :  { %v152_v10 = vpop.f32.mrf.mxu0 }
 0x16f   :  { %v112_v11 = vpop.xlane.xlu0 %111 }
 0x170   :  { %v113_v12 = vsub.f32 %v106_v7, %v112_v11 }
 0x172   :  { %v114_v13 = vmul.f32 1.442695, %v113_v12 }
 0x174   :  { %162 = vpow2.f32 %v114_v13 }
 0x181   :  { %v163_v14 = vpop.eup %162 }
 0x182   :  { %116 = vadd.xlane.f32.xlu0 %v163_v14 }
 0x20b   :  { %v117_v15 = vpop.xlane.xlu0 %116 }
 0x20c   :  { %164 = vlog2.f32 %v117_v15 }
 0x219   :  { %v165_v16 = vpop.eup %164 }
 0x21a   :  { %v119_v17 = vmul.f32 0.6931472, %v165_v16 }
 0x21c   :  { %v120_v18 = vsub.f32 %v113_v12, %v119_v17 }
 0x21e   :  { %121 = vst [vmem:[#allocation7] sm:$0xff] %v120_v18 }
 0x21f   :  { %217 = shalt.err (!%p214_p0)
}
 0x220   :  { %131 = dma.vmem_to_hbm [thread:$0]  %s129_s25, 128, %s274_s3, [#allocation4]  }
 0x221   :  { %230 = dma.done.wait [#allocation4], 128  }
 0x222   :  { %231 = vsyncadd [#allocation4], 4294967168 }
 0x223   :  { %135 = vsyncpa [#allocation3], 1 }
 0x224   :  { %136 = vsyncpa [#allocation6], 1 }
 0x225   :  { %137 = vsyncpa [#allocation4], 1 }

</bundles_post_ra>
